<compile_context>
chip_gen: v7x
topology: tpu7x:2x2x1
jax: 0.10.0
libtpu: 0.0.40
codegen_flags: <defaults>
</compile_context>

<pallas_src>
import functools

import jax
import jax.numpy as jnp
from jax.experimental import pallas as pl
from jax.experimental.pallas import tpu as pltpu


def _round_up(x, m):
    return ((x + m - 1) // m) * m


def _vmem_capacity_bytes():
    """Per-core VMEM capacity; generation-aware (v5e/v6e 128 MiB, v7x 64 MiB)."""
    try:
        cap = getattr(pltpu.get_tpu_info(), "vmem_capacity_bytes", None)
        if cap:
            return int(cap)
    except Exception:  # conservative fallback (v7x-sized)
        pass
    return 64 << 20


def _choose_row_tile(ho, wo, bytes_per_row, budget_bytes, align):
    """Largest divisor th of ho whose tile fits budget_bytes.

    (th*wo) % align == 0 (or th == ho, i.e. a full-extent block) is a *hard*
    constraint so the BlockSpec last-two-dim rules stay legal and stores stay
    lane/sublane dense.  If nothing fits, returns the smallest legal tile
    (never the previous "biggest candidate regardless of budget" fallback).
    """
    divisors = [d for d in range(1, ho + 1) if ho % d == 0]
    legal = [d for d in divisors if (d * wo) % align == 0 or d == ho]
    fitting = [d for d in legal if d * bytes_per_row <= budget_bytes]
    if fitting:
        return max(fitting)
    return min(legal)


# ---------------------------------------------------------------------------
# Pass 1: fused im2col + single long-K matmul (bf16 MXU in / f32 acc) +
#         per-(image, row-tile) partial BN statistics.
#         grid = (N, Ho // th), both axes "parallel".
# ---------------------------------------------------------------------------
def _conv_stats_kernel(x_ref, w_ref, y_ref, psum_ref, psumsq_ref, *,
                       k, stride, th, wo, cin, cout_p, rows_s):
    t = pl.program_id(1)
    row0 = t * (th * stride)                  # first padded-input row of tile

    # Fused im2col: concatenate all k*k taps along channels -> one
    # (th*wo, k*k*cin) patch slab, then a single MXU dot with K = k*k*cin
    # (the MXU does the tap reduction internally; no f32 acc RMW passes).
    taps = []
    for kh in range(k):                       # static unroll over kernel taps
        for kw in range(k):
            if stride == 1:
                xs = x_ref[0, pl.ds(row0 + kh, th), pl.ds(kw, wo), :]
            else:
                xs = x_ref[0, pl.ds(row0 + kh, th, stride),
                           pl.ds(kw, wo, stride), :]
            taps.append(xs)
    patch = taps[0] if len(taps) == 1 else jnp.concatenate(taps, axis=-1)
    patch = patch.reshape(th * wo, k * k * cin)
    acc = jnp.dot(patch, w_ref[...], preferred_element_type=jnp.float32)

    y_ref[0] = acc.astype(y_ref.dtype)        # bf16 writeback (halved traffic)

    # Per-tile partial BN statistics.  With rows_s == 8 we keep 8 sublane
    # partial sums (pure VPU vreg adds, no cross-sublane XLU reduce) and let
    # the tiny XLA epilogue collapse them.
    if rows_s == 8:
        part = acc.reshape((th * wo) // 8, 8, cout_p)
        psum_ref[0, 0] = jnp.sum(part, axis=0)
        psumsq_ref[0, 0] = jnp.sum(part * part, axis=0)
    else:
        psum_ref[0, 0] = jnp.sum(acc, axis=0, keepdims=True)
        psumsq_ref[0, 0] = jnp.sum(acc * acc, axis=0, keepdims=True)


# ---------------------------------------------------------------------------
# Pass 2: y * scale + shift, strip channel padding and emit NCHW directly
#         (in-kernel XLU transpose -> lane-dense (Cout, Ho*Wo) stores).
# ---------------------------------------------------------------------------
def _bn_transpose_kernel(y_ref, scale_ref, shift_ref, o_ref, *, cout):
    z = y_ref[0].astype(jnp.float32) * scale_ref[...] + shift_ref[...]
    o_ref[0] = z.T[:cout, :]                  # XLU transpose + pad strip


@functools.partial(jax.jit, static_argnames=("stride", "padding", "eps"))
def conv_bn_forward(x, weight, gamma, beta, *, stride=1, padding=0, eps=1e-5):
    n, cin, h, w = x.shape
    cout, cin_w, k, k2 = weight.shape
    assert cin_w == cin and k == k2, "unexpected weight shape"

    ho = (h + 2 * padding - k) // stride + 1
    wo = (w + 2 * padding - k) // stride + 1
    assert ho >= 1 and wo >= 1
    hp, wp = h + 2 * padding, w + 2 * padding
    cout_p = _round_up(cout, 128)             # lane-dense matmul / y channels
    kkc = k * k * cin

    # ---- generation-aware VMEM budgeting -----------------------------------
    cap = _vmem_capacity_bytes()
    vmem_limit = max(32 << 20, min(cap - (16 << 20), 96 << 20))

    # ---- layout prep in XLA: single pass over x / w, no k^2 HBM blow-up ----
    x_nhwc = jnp.transpose(x.astype(jnp.bfloat16), (0, 2, 3, 1))
    if padding > 0:
        x_nhwc = jnp.pad(
            x_nhwc, ((0, 0), (padding, padding), (padding, padding), (0, 0)))
    # (Cout, Cin, kh, kw) -> (kh, kw, Cin, Cout) -> (k*k*Cin, Cout_p), bf16,
    # zero-padded channels so BN stats of real channels are unaffected.
    w_r = jnp.transpose(weight, (2, 3, 1, 0)).reshape(kkc, cout)
    w_r = jnp.pad(w_r, ((0, 0), (0, cout_p - cout))).astype(jnp.bfloat16)

    # ---- pass-1 row tiling --------------------------------------------------
    # TODO(synk): for very large images, replace the full-image x block with a
    # row-halo block (pl.Element on H) so v7x's 64 MiB VMEM is never exceeded.
    fixed1 = 2 * hp * wp * cin * 2 + 2 * kkc * cout_p * 2 + (1 << 20)
    per_row1 = wo * (cout_p * 12 + kkc * 4)   # y dbl-buf + f32 acc/acc^2 + patch
    th = _choose_row_tile(ho, wo, per_row1,
                          max(4 << 20, vmem_limit - fixed1 - (4 << 20)),
                          align=16)           # bf16 y block: sublane mult of 16
    t_steps = ho // th
    rows_s = 8 if (th * wo) % 8 == 0 else 1

    m_total = n * ho * wo
    flops = 2 * m_total * kkc * cout_p
    bytes_accessed = (x_nhwc.size * 2 + w_r.size * 2
                      + m_total * cout_p * 2
                      + 2 * n * t_steps * rows_s * cout_p * 4)

    kernel1 = functools.partial(_conv_stats_kernel, k=k, stride=stride, th=th,
                                wo=wo, cin=cin, cout_p=cout_p, rows_s=rows_s)

    # TODO(synk): w_r is grid-invariant but still double-buffered; pl.Buffered(1)
    # on its BlockSpec would free one weight copy of VMEM on v7x.
    y, psum, psumsq = pl.pallas_call(
        kernel1,
        out_shape=(
            jax.ShapeDtypeStruct((n, ho * wo, cout_p), jnp.bfloat16),
            jax.ShapeDtypeStruct((n, t_steps, rows_s, cout_p), jnp.float32),
            jax.ShapeDtypeStruct((n, t_steps, rows_s, cout_p), jnp.float32),
        ),
        grid_spec=pltpu.PrefetchScalarGridSpec(
            num_scalar_prefetch=0,
            grid=(n, t_steps),
            in_specs=[
                pl.BlockSpec((1, hp, wp, cin), lambda i, t: (i, 0, 0, 0)),
                pl.BlockSpec((kkc, cout_p), lambda i, t: (0, 0)),
            ],
            out_specs=[
                pl.BlockSpec((1, th * wo, cout_p), lambda i, t: (i, t, 0)),
                pl.BlockSpec((1, 1, rows_s, cout_p), lambda i, t: (i, t, 0, 0)),
                pl.BlockSpec((1, 1, rows_s, cout_p), lambda i, t: (i, t, 0, 0)),
            ],
        ),
        compiler_params=pltpu.CompilerParams(
            dimension_semantics=("parallel", "parallel"),
            vmem_limit_bytes=vmem_limit,
        ),
        cost_estimate=pl.CostEstimate(flops=flops, transcendentals=0,
                                      bytes_accessed=bytes_accessed),
    )(x_nhwc, w_r)

    # ---- BN statistics -> per-channel scale / shift (tiny, f32, clamped) ---
    m_f = float(m_total)
    ch_sum = jnp.sum(psum, axis=(0, 1, 2))                     # (Cout_p,)
    ch_sumsq = jnp.sum(psumsq, axis=(0, 1, 2))
    mean = ch_sum / m_f
    var = jnp.maximum(ch_sumsq / m_f - mean * mean, 0.0)       # biased, clamped
    gamma_p = jnp.pad(gamma.astype(jnp.float32), (0, cout_p - cout))
    beta_p = jnp.pad(beta.astype(jnp.float32), (0, cout_p - cout))
    inv = gamma_p * jax.lax.rsqrt(var + eps)
    scale = inv.reshape(1, cout_p)
    shift = (beta_p - mean * inv).reshape(1, cout_p)

    # ---- pass 2: fused normalize + channel-pad strip + NCHW transpose ------
    per_row2 = wo * (cout_p * 12 + cout * 8)
    th2 = _choose_row_tile(ho, wo, per_row2,
                           max(4 << 20, vmem_limit - (4 << 20)),
                           align=128)         # lane-dense transposed stores
    hw2 = th2 * wo
    kernel2 = functools.partial(_bn_transpose_kernel, cout=cout)

    out_chw = pl.pallas_call(
        kernel2,
        out_shape=jax.ShapeDtypeStruct((n, cout, ho * wo), jnp.float32),
        grid_spec=pltpu.PrefetchScalarGridSpec(
            num_scalar_prefetch=0,
            grid=(n, ho // th2),
            in_specs=[
                pl.BlockSpec((1, hw2, cout_p), lambda i, t: (i, t, 0)),
                pl.BlockSpec((1, cout_p), lambda i, t: (0, 0)),
                pl.BlockSpec((1, cout_p), lambda i, t: (0, 0)),
            ],
            out_specs=pl.BlockSpec((1, cout, hw2), lambda i, t: (i, 0, t)),
        ),
        compiler_params=pltpu.CompilerParams(
            dimension_semantics=("parallel", "parallel"),
            vmem_limit_bytes=vmem_limit,
        ),
    )(y, scale, shift)

    return out_chw.reshape(n, cout, ho, wo)    # free contiguous reshape


# ---------------------------------------------------------------------------
# Pure-JAX reference (same bf16-rounded conv inputs, f32 math).
# ---------------------------------------------------------------------------
def _ref_conv_bn(x, weight, gamma, beta, *, stride=1, padding=0, eps=1e-5):
    xb = x.astype(jnp.bfloat16).astype(jnp.float32)
    wb = weight.astype(jnp.bfloat16).astype(jnp.float32)
    y = jax.lax.conv_general_dilated(
        xb, wb, window_strides=(stride, stride),
        padding=[(padding, padding), (padding, padding)],
        dimension_numbers=("NCHW", "OIHW", "NCHW"),
        precision=jax.lax.Precision.HIGHEST)
    mean = jnp.mean(y, axis=(0, 2, 3), keepdims=True)
    var = jnp.var(y, axis=(0, 2, 3), keepdims=True)            # biased
    g = gamma.reshape(1, -1, 1, 1).astype(jnp.float32)
    b = beta.reshape(1, -1, 1, 1).astype(jnp.float32)
    return (y - mean) * g * jax.lax.rsqrt(var + eps) + b


if __name__ == "__main__":
    def run_case(case_key, n, cin, spatial, cout, k, s, p):
        kx, kw_ = jax.random.split(case_key)
        x = jax.random.normal(kx, (n, cin, spatial, spatial), dtype=jnp.float32)
        fan_in = cin * k * k
        bound = 1.0 / (fan_in ** 0.5)
        weight = jax.random.uniform(kw_, (cout, cin, k, k), dtype=jnp.float32,
                                    minval=-bound, maxval=bound)
        gamma = jnp.ones((cout,), jnp.float32)  # BatchNorm2d default affine init
        beta = jnp.zeros((cout,), jnp.float32)

        out = conv_bn_forward(x, weight, gamma, beta, stride=s, padding=p)
        out = jax.block_until_ready(out)
        ref = _ref_conv_bn(x, weight, gamma, beta, stride=s, padding=p)
        assert out.shape == ref.shape, (out.shape, ref.shape)
        # Tolerance covers the bf16 intermediate activations (<= ~0.4% rel)
        # on top of the bf16-rounded conv inputs.
        assert jnp.allclose(out, ref, atol=2e-2, rtol=2e-2), (
            f"mismatch k={k} s={s} p={p}: max err {jnp.max(jnp.abs(out - ref))}")

    key = jax.random.PRNGKey(0)
    k1, k2 = jax.random.split(key)
    run_case(k1, 2, 4, 16, 8, 1, 1, 0)   # module defaults: kernel=1, stride=1, pad=0
    run_case(k2, 2, 4, 16, 8, 3, 1, 1)   # 3x3 / pad=1 exercises the fused im2col taps
    print("KERNEL_OK")
</pallas_src>

<mosaic_0001>
module attributes {stable_mosaic.version = 11 : i64} {
  func.func @_bn_transpose_kernel(%arg0: i32, %arg1: i32, %arg2: memref<1x256x128xbf16, #tpu.memory_space<vmem>>, %arg3: memref<1x128xf32, #tpu.memory_space<vmem>>, %arg4: memref<1x128xf32, #tpu.memory_space<vmem>>, %arg5: memref<1x8x256xf32, #tpu.memory_space<vmem>>) attributes {dimension_semantics = [#tpu.dimension_semantics<parallel>, #tpu.dimension_semantics<parallel>], iteration_bounds = array<i64: 2, 1>, scalar_prefetch = 0 : i64, scratch_operands = 0 : i64, tpu.core_type = #tpu.core_type<tc>, window_params = [{transform_indices = @transform_0, window_bounds = array<i64: 1, 256, 128>}, {pipeline_mode = #tpu.pipeline_mode<synchronous>, transform_indices = @transform_1, window_bounds = array<i64: 1, 128>}, {pipeline_mode = #tpu.pipeline_mode<synchronous>, transform_indices = @transform_2, window_bounds = array<i64: 1, 128>}, {transform_indices = @transform_3, window_bounds = array<i64: 1, 8, 256>}]} {
    %c0 = arith.constant 0 : index
    %c0_0 = arith.constant 0 : index
    %c0_1 = arith.constant 0 : index
    %0 = vector.load %arg2[%c0, %c0_0, %c0_1] : memref<1x256x128xbf16, #tpu.memory_space<vmem>>, vector<1x256x128xbf16>
    %1 = vector.shape_cast %0 : vector<1x256x128xbf16> to vector<256x128xbf16>
    %2 = arith.extf %1 : vector<256x128xbf16> to vector<256x128xf32>
    %c0_2 = arith.constant 0 : index
    %c0_3 = arith.constant 0 : index
    %3 = vector.load %arg3[%c0_2, %c0_3] : memref<1x128xf32, #tpu.memory_space<vmem>>, vector<1x128xf32>
    %4 = vector.broadcast %3 : vector<1x128xf32> to vector<256x128xf32>
    %5 = arith.mulf %2, %4 : vector<256x128xf32>
    %c0_4 = arith.constant 0 : index
    %c0_5 = arith.constant 0 : index
    %6 = vector.load %arg4[%c0_4, %c0_5] : memref<1x128xf32, #tpu.memory_space<vmem>>, vector<1x128xf32>
    %7 = vector.broadcast %6 : vector<1x128xf32> to vector<256x128xf32>
    %8 = arith.addf %5, %7 : vector<256x128xf32>
    %9 = tpu.transpose %8, [1, 0] : vector<256x128xf32> -> vector<128x256xf32>
    %10 = vector.extract_strided_slice %9 {offsets = [0, 0], sizes = [8, 256], strides = [1, 1]} : vector<128x256xf32> to vector<8x256xf32>
    %c0_6 = arith.constant 0 : index
    %c0_7 = arith.constant 0 : index
    %c0_8 = arith.constant 0 : index
    %11 = vector.load %arg5[%c0_6, %c0_7, %c0_8] : memref<1x8x256xf32, #tpu.memory_space<vmem>>, vector<1x8x256xf32>
    %12 = vector.shape_cast %11 : vector<1x8x256xf32> to vector<8x256xf32>
    %13 = vector.shape_cast %10 : vector<8x256xf32> to vector<1x8x256xf32>
    tpu.vector_store %arg5[%c0_6, %c0_7, %c0_8], %13 {strides = array<i32>} : memref<1x8x256xf32, #tpu.memory_space<vmem>>, vector<1x8x256xf32>,
    return
  }
  func.func @transform_0(%arg0: i32, %arg1: i32) -> (i32, i32, i32) {
    %c0_i32 = arith.constant 0 : i32
    %c0_i32_0 = arith.constant 0 : i32
    return %arg0, %arg1, %c0_i32 : i32, i32, i32
  }
  func.func @transform_1(%arg0: i32, %arg1: i32) -> (i32, i32) {
    %c0_i32 = arith.constant 0 : i32
    %c0_i32_0 = arith.constant 0 : i32
    %c0_i32_1 = arith.constant 0 : i32
    return %c0_i32, %c0_i32_0 : i32, i32
  }
  func.func @transform_2(%arg0: i32, %arg1: i32) -> (i32, i32) {
    %c0_i32 = arith.constant 0 : i32
    %c0_i32_0 = arith.constant 0 : i32
    %c0_i32_1 = arith.constant 0 : i32
    return %c0_i32, %c0_i32_0 : i32, i32
  }
  func.func @transform_3(%arg0: i32, %arg1: i32) -> (i32, i32, i32) {
    %c0_i32 = arith.constant 0 : i32
    %c0_i32_0 = arith.constant 0 : i32
    return %arg0, %c0_i32, %arg1 : i32, i32, i32
  }
}

module attributes {stable_mosaic.version = 11 : i64} {
  func.func @_conv_stats_kernel(%arg0: i32, %arg1: i32, %arg2: memref<1x16x16x4xbf16, #tpu.memory_space<vmem>>, %arg3: memref<4x128xbf16, #tpu.memory_space<vmem>>, %arg4: memref<1x256x128xbf16, #tpu.memory_space<vmem>>, %arg5: memref<1x1x8x128xf32, #tpu.memory_space<vmem>>, %arg6: memref<1x1x8x128xf32, #tpu.memory_space<vmem>>) attributes {dimension_semantics = [#tpu.dimension_semantics<parallel>, #tpu.dimension_semantics<parallel>], iteration_bounds = array<i64: 2, 1>, scalar_prefetch = 0 : i64, scratch_operands = 0 : i64, tpu.core_type = #tpu.core_type<tc>, window_params = [{transform_indices = @transform_0, window_bounds = array<i64: 1, 16, 16, 4>}, {pipeline_mode = #tpu.pipeline_mode<synchronous>, transform_indices = @transform_1, window_bounds = array<i64: 4, 128>}, {transform_indices = @transform_2, window_bounds = array<i64: 1, 256, 128>}, {transform_indices = @transform_3, window_bounds = array<i64: 1, 1, 8, 128>}, {transform_indices = @transform_4, window_bounds = array<i64: 1, 1, 8, 128>}]} {
    %c16_i32 = arith.constant 16 : i32
    %0 = arith.muli %arg1, %c16_i32 : i32
    %c0_i32 = arith.constant 0 : i32
    %1 = arith.addi %0, %c0_i32 : i32
    %c0 = arith.constant 0 : index
    %2 = arith.index_cast %1 : i32 to index
    %c0_0 = arith.constant 0 : index
    %c0_1 = arith.constant 0 : index
    %3 = vector.load %arg2[%c0, %2, %c0_0, %c0_1] : memref<1x16x16x4xbf16, #tpu.memory_space<vmem>>, vector<1x16x16x4xbf16>
    %4 = vector.shape_cast %3 : vector<1x16x16x4xbf16> to vector<16x16x4xbf16>
    %5 = vector.shape_cast %4 : vector<16x16x4xbf16> to vector<256x4xbf16>
    %c0_2 = arith.constant 0 : index
    %c0_3 = arith.constant 0 : index
    %6 = vector.load %arg3[%c0_2, %c0_3] : memref<4x128xbf16, #tpu.memory_space<vmem>>, vector<4x128xbf16>
    %cst = arith.constant dense<0.000000e+00> : vector<256x128xf32>
    %7 = tpu.matmul %5, %6, %cst {dimension_numbers = #tpu.dot_dimension_numbers<[1], [0], [0], [1], [0, 0, 1, 1], [], []>} : vector<256x4xbf16>, vector<4x128xbf16>, vector<256x128xf32> -> vector<256x128xf32>
    %8 = arith.truncf %7 : vector<256x128xf32> to vector<256x128xbf16>
    %c0_4 = arith.constant 0 : index
    %c0_5 = arith.constant 0 : index
    %c0_6 = arith.constant 0 : index
    %9 = vector.load %arg4[%c0_4, %c0_5, %c0_6] : memref<1x256x128xbf16, #tpu.memory_space<vmem>>, vector<1x256x128xbf16>
    %10 = vector.shape_cast %9 : vector<1x256x128xbf16> to vector<256x128xbf16>
    %11 = vector.shape_cast %8 : vector<256x128xbf16> to vector<1x256x128xbf16>
    tpu.vector_store %arg4[%c0_4, %c0_5, %c0_6], %11 {strides = array<i32>} : memref<1x256x128xbf16, #tpu.memory_space<vmem>>, vector<1x256x128xbf16>,
    %12 = vector.shape_cast %7 : vector<256x128xf32> to vector<32x8x128xf32>
    %cst_7 = arith.constant dense<0.000000e+00> : vector<8x128xf32>
    %13 = vector.multi_reduction <add>, %12, %cst_7 [0] : vector<32x8x128xf32> to vector<8x128xf32>
    %c0_8 = arith.constant 0 : index
    %c0_9 = arith.constant 0 : index
    %c0_10 = arith.constant 0 : index
    %c0_11 = arith.constant 0 : index
    %14 = vector.load %arg5[%c0_8, %c0_9, %c0_10, %c0_11] : memref<1x1x8x128xf32, #tpu.memory_space<vmem>>, vector<1x1x8x128xf32>
    %15 = vector.shape_cast %14 : vector<1x1x8x128xf32> to vector<8x128xf32>
    %16 = vector.shape_cast %13 : vector<8x128xf32> to vector<1x1x8x128xf32>
    tpu.vector_store %arg5[%c0_8, %c0_9, %c0_10, %c0_11], %16 {strides = array<i32>} : memref<1x1x8x128xf32, #tpu.memory_space<vmem>>, vector<1x1x8x128xf32>,
    %17 = arith.mulf %12, %12 : vector<32x8x128xf32>
    %cst_12 = arith.constant dense<0.000000e+00> : vector<8x128xf32>
    %18 = vector.multi_reduction <add>, %17, %cst_12 [0] : vector<32x8x128xf32> to vector<8x128xf32>
    %c0_13 = arith.constant 0 : index
    %c0_14 = arith.constant 0 : index
    %c0_15 = arith.constant 0 : index
    %c0_16 = arith.constant 0 : index
    %19 = vector.load %arg6[%c0_13, %c0_14, %c0_15, %c0_16] : memref<1x1x8x128xf32, #tpu.memory_space<vmem>>, vector<1x1x8x128xf32>
    %20 = vector.shape_cast %19 : vector<1x1x8x128xf32> to vector<8x128xf32>
    %21 = vector.shape_cast %18 : vector<8x128xf32> to vector<1x1x8x128xf32>
    tpu.vector_store %arg6[%c0_13, %c0_14, %c0_15, %c0_16], %21 {strides = array<i32>} : memref<1x1x8x128xf32, #tpu.memory_space<vmem>>, vector<1x1x8x128xf32>,
    return
  }
  func.func @transform_0(%arg0: i32, %arg1: i32) -> (i32, i32, i32, i32) {
    %c0_i32 = arith.constant 0 : i32
    %c0_i32_0 = arith.constant 0 : i32
    %c0_i32_1 = arith.constant 0 : i32
    %c0_i32_2 = arith.constant 0 : i32
    return %arg0, %c0_i32, %c0_i32_0, %c0_i32_1 : i32, i32, i32, i32
  }
  func.func @transform_1(%arg0: i32, %arg1: i32) -> (i32, i32) {
    %c0_i32 = arith.constant 0 : i32
    %c0_i32_0 = arith.constant 0 : i32
    %c0_i32_1 = arith.constant 0 : i32
    return %c0_i32, %c0_i32_0 : i32, i32
  }
  func.func @transform_2(%arg0: i32, %arg1: i32) -> (i32, i32, i32) {
    %c0_i32 = arith.constant 0 : i32
    %c0_i32_0 = arith.constant 0 : i32
    return %arg0, %arg1, %c0_i32 : i32, i32, i32
  }
  func.func @transform_3(%arg0: i32, %arg1: i32) -> (i32, i32, i32, i32) {
    %c0_i32 = arith.constant 0 : i32
    %c0_i32_0 = arith.constant 0 : i32
    %c0_i32_1 = arith.constant 0 : i32
    return %arg0, %arg1, %c0_i32, %c0_i32_0 : i32, i32, i32, i32
  }
  func.func @transform_4(%arg0: i32, %arg1: i32) -> (i32, i32, i32, i32) {
    %c0_i32 = arith.constant 0 : i32
    %c0_i32_0 = arith.constant 0 : i32
    %c0_i32_1 = arith.constant 0 : i32
    return %arg0, %arg1, %c0_i32, %c0_i32_0 : i32, i32, i32, i32
  }
}

</mosaic_0001>

<bundles_post_ra>
// kernel: conv_bn_forward.3
= control target key start
LH: loop header
LB: loop body
LE: loop exit
PB: predicated region body
PF: predicated region fallthrough
CT: control target
= control target key end

     0   :  { %s667_s12 = smov 0   ;;  %s669_s13 = smov 0   ;;  %s796_s0 = inlined_call_operand.vmem [shape: bf16[2,256,128], index: 0, kind: input, shape index: {}]   ;;  %s797_s1 = inlined_call_operand.vmem [shape: f32[1,128], index: 1, kind: input, shape index: {}]   ;;  %s798_s2 = inlined_call_operand.vmem [shape: f32[1,128], index: 2, kind: input, shape index: {}]   ;;  %s799_s3 = inlined_call_operand.vmem [shape: f32[2,8,256], index: 3, kind: output, shape index: {}]  }
   0x1   :  { %s671_s14 = smov 0  }
   0x2 LB: > { %s25_s15 = sadd.s32 1, %s641_s13  ;;  %p509_p0 = scmp.ge.s32.totalorder %s645_s14, 1  ;;  %s645_s14 = sphi %s671_s14, %s13_s14   ;;  %s641_s13 = sphi %s669_s13, %s801_s13   ;;  %s637_s12 = sphi %s667_s12, %s800_s12  }
   0x3   : > { %p27_p1 = scmp.ge.s32.totalorder %s25_s15, 2  ;;  %p158_p2 = scmp.lt.s32.totalorder %s645_s14, 3 }
   0x5   : > { %s803_s15 = smov (%p27_p1, %s25_s15), 0  ;;  %p159_p3 = pnand %p509_p0, %p158_p2 }
   0x6   : > { %p191_p4 = scmp.lt.s32.totalorder (!%p159_p3), %s637_s12, 1  ;;  %v696_v0 = vld [vmem:[%s797_s1] ss:$0 sm:$0xff] (!%p159_p3) }
   0x7   : > { %162 = sbr.rel (%p159_p3) target bundleno = 155 (0x9b), region = 32  ;;  %v705_v9 = vld [vmem:[%s798_s2] ss:$0 sm:$0xff] (!%p159_p3) }
   0xe   : > { %s805_s12 = smov (!%p191_p4, %s637_s12), 1 }
   0xf   : > { %s518_s16 = sshll.u32 %s805_s12, 7  ;;  %s519_s24 = sshll.u32 %s805_s12, 4 }
  0x10   : > { %s691_s19 = scalar_lea.vmem %s796_s0, %s518_s16  ;;  %s208_s27 = scalar_lea.vmem %s799_s3, %s519_s24 }
  0x11   : > { %v591_v1 = vld [vmem:[%s691_s19 + $0x40] sm:$0xff]   ;;  %v592_v3 = vld [vmem:[%s691_s19 + $0x48] sm:$0xff]   ;;  %v593_v24 = vld [vmem:[%s691_s19 + $0x50] sm:$0xff]  }
  0x12   : > { %v521_v2 = vld [vmem:[%s691_s19] sm:$0xff]   ;;  %v554_v4 = vunpack.c.l.bf16 %v591_v1  ;;  %v555_v6 = vunpack.c.h.bf16 %v591_v1  ;;  %v584_v8 = vld [vmem:[%s691_s19 + $0x8] sm:$0xff]   ;;  %v558_v10 = vunpack.c.l.bf16 %v592_v3  ;;  %v559_v19 = vunpack.c.h.bf16 %v592_v3  ;;  %v585_v25 = vld [vmem:[%s691_s19 + $0x10] sm:$0xff]  }
  0x13   : > { %v522_v5 = vunpack.c.l.bf16 %v521_v2  ;;  %v523_v7 = vunpack.c.h.bf16 %v521_v2  ;;  %v526_v11 = vunpack.c.l.bf16 %v584_v8  ;;  %v527_v20 = vunpack.c.h.bf16 %v584_v8  ;;  %v594_v38 = vld [vmem:[%s691_s19 + $0x58] sm:$0xff]   ;;  %v595_v52 = vld [vmem:[%s691_s19 + $0x60] sm:$0xff]   ;;  %v596_v3 = vld [vmem:[%s691_s19 + $0x68] sm:$0xff]  }
  0x14   : > { %v297_v12 = vmul.f32 %v554_v4, %v696_v0  ;;  %v298_v14 = vmul.f32 %v555_v6, %v696_v0  ;;  %v299_v18 = vmul.f32 %v558_v10, %v696_v0  ;;  %v300_v26 = vmul.f32 %v559_v19, %v696_v0  ;;  %v586_v39 = vld [vmem:[%s691_s19 + $0x18] sm:$0xff]   ;;  %v587_v53 = vld [vmem:[%s691_s19 + $0x20] sm:$0xff]   ;;  %v588_v4 = vld [vmem:[%s691_s19 + $0x28] sm:$0xff]  }
  0x15   : > { %v281_v13 = vmul.f32 %v522_v5, %v696_v0  ;;  %v282_v15 = vmul.f32 %v523_v7, %v696_v0  ;;  %v283_v23 = vmul.f32 %v526_v11, %v696_v0  ;;  %v284_v27 = vmul.f32 %v527_v20, %v696_v0  ;;  %v589_v19 = vld [vmem:[%s691_s19 + $0x30] sm:$0xff]  }
  0x16   : > { %v336_v16 = vadd.f32 %v705_v9, %v297_v12  ;;  %v337_v21 = vadd.f32 %v705_v9, %v298_v14  ;;  %v338_v28 = vadd.f32 %v705_v9, %v299_v18  ;;  %v562_v30 = vunpack.c.l.bf16 %v593_v24  ;;  %v597_v18 = vld [vmem:[%s691_s19 + $0x70] sm:$0xff]  }
  0x17   : > { %v320_v17 = vadd.f32 %v705_v9, %v281_v13  ;;  %v321_v22 = vadd.f32 %v705_v9, %v282_v15  ;;  %v322_v29 = vadd.f32 %v705_v9, %v283_v23  ;;  %v530_v31 = vunpack.c.l.bf16 %v585_v25 }
  0x18   : > { %384 = vxpose.xlu1.b32.start [1/16] (narrow) %v336_v16, 8  ;;  %v339_v32 = vadd.f32 %v705_v9, %v300_v26  ;;  %v563_v33 = vunpack.c.h.bf16 %v593_v24  ;;  %v323_v34 = vadd.f32 %v705_v9, %v284_v27  ;;  %v301_v35 = vmul.f32 %v562_v30, %v696_v0 }
  0x19   : > { %352 = vxpose.xlu0.b32.start [1/16] (narrow) %v320_v17, 8  ;;  %v285_v36 = vmul.f32 %v530_v31, %v696_v0  ;;  %v531_v37 = vunpack.c.h.bf16 %v585_v25  ;;  %v566_v41 = vunpack.c.l.bf16 %v594_v38  ;;  %v534_v45 = vunpack.c.l.bf16 %v586_v39 }
  0x1a   : > { %v302_v40 = vmul.f32 %v563_v33, %v696_v0  ;;  %v340_v42 = vadd.f32 %v705_v9, %v301_v35  ;;  %v567_v47 = vunpack.c.h.bf16 %v594_v38  ;;  %v535_v51 = vunpack.c.h.bf16 %v586_v39  ;;  %v590_v33 = vld [vmem:[%s691_s19 + $0x38] sm:$0xff]  }
  0x1b   : > { %v324_v43 = vadd.f32 %v705_v9, %v285_v36  ;;  %v286_v44 = vmul.f32 %v531_v37, %v696_v0  ;;  %v303_v46 = vmul.f32 %v566_v41, %v696_v0  ;;  %v287_v50 = vmul.f32 %v534_v45, %v696_v0 }
  0x1c   : > { %385 = vxpose.xlu1.b32.cont [2/16] (narrow) %v337_v21, 8  ;;  %v341_v48 = vadd.f32 %v705_v9, %v302_v40  ;;  %v304_v54 = vmul.f32 %v567_v47, %v696_v0  ;;  %v570_v55 = vunpack.c.l.bf16 %v595_v52  ;;  %v288_v58 = vmul.f32 %v535_v51, %v696_v0 }
  0x1d   : > { %353 = vxpose.xlu0.b32.cont [2/16] (narrow) %v321_v22, 8  ;;  %v325_v49 = vadd.f32 %v705_v9, %v286_v44  ;;  %v342_v56 = vadd.f32 %v705_v9, %v303_v46  ;;  %v326_v57 = vadd.f32 %v705_v9, %v287_v50  ;;  %v538_v59 = vunpack.c.l.bf16 %v587_v53 }
  0x1e   : > { %v343_v60 = vadd.f32 %v705_v9, %v304_v54  ;;  %v305_v61 = vmul.f32 %v570_v55, %v696_v0  ;;  %v327_v62 = vadd.f32 %v705_v9, %v288_v58  ;;  %v571_v1 = vunpack.c.h.bf16 %v595_v52 }
  0x1f   : > { %v289_v63 = vmul.f32 %v538_v59, %v696_v0  ;;  %v539_v2 = vunpack.c.h.bf16 %v587_v53  ;;  %v574_v6 = vunpack.c.l.bf16 %v596_v3  ;;  %v542_v11 = vunpack.c.l.bf16 %v588_v4 }
  0x20   : > { %386 = vxpose.xlu1.b32.cont [3/16] (narrow) %v338_v28, 8  ;;  %v344_v5 = vadd.f32 %v705_v9, %v305_v61  ;;  %v306_v8 = vmul.f32 %v571_v1, %v696_v0  ;;  %v575_v13 = vunpack.c.h.bf16 %v596_v3  ;;  %v543_v17 = vunpack.c.h.bf16 %v588_v4 }
  0x21   : > { %354 = vxpose.xlu0.b32.cont [3/16] (narrow) %v322_v29, 8  ;;  %v328_v7 = vadd.f32 %v705_v9, %v289_v63  ;;  %v290_v10 = vmul.f32 %v539_v2, %v696_v0  ;;  %v307_v12 = vmul.f32 %v574_v6, %v696_v0  ;;  %v291_v16 = vmul.f32 %v542_v11, %v696_v0 }
  0x22   : > { %v345_v14 = vadd.f32 %v705_v9, %v306_v8  ;;  %v308_v20 = vmul.f32 %v575_v13, %v696_v0  ;;  %v578_v21 = vunpack.c.l.bf16 %v597_v18  ;;  %v292_v24 = vmul.f32 %v543_v17, %v696_v0 }
  0x23   : > { %v329_v15 = vadd.f32 %v705_v9, %v290_v10  ;;  %v346_v22 = vadd.f32 %v705_v9, %v307_v12  ;;  %v330_v23 = vadd.f32 %v705_v9, %v291_v16  ;;  %v546_v25 = vunpack.c.l.bf16 %v589_v19 }
  0x24   : > { %387 = vxpose.xlu1.b32.cont [4/16] (narrow) %v339_v32, 8  ;;  %v347_v26 = vadd.f32 %v705_v9, %v308_v20  ;;  %v309_v27 = vmul.f32 %v578_v21, %v696_v0  ;;  %v331_v28 = vadd.f32 %v705_v9, %v292_v24  ;;  %v579_v30 = vunpack.c.h.bf16 %v597_v18  ;;  %v598_v32 = vld [vmem:[%s691_s19 + $0x78] sm:$0xff]  }
  0x25   : > { %355 = vxpose.xlu0.b32.cont [4/16] (narrow) %v323_v34, 8  ;;  %v293_v29 = vmul.f32 %v546_v25, %v696_v0  ;;  %v547_v31 = vunpack.c.h.bf16 %v589_v19  ;;  %v582_v35 = vunpack.c.l.bf16 %v598_v32  ;;  %v550_v39 = vunpack.c.l.bf16 %v590_v33 }
  0x26   : > { %v348_v34 = vadd.f32 %v705_v9, %v309_v27  ;;  %v310_v37 = vmul.f32 %v579_v30, %v696_v0  ;;  %v583_v41 = vunpack.c.h.bf16 %v598_v32  ;;  %v551_v45 = vunpack.c.h.bf16 %v590_v33 }
  0x27   : > { %v332_v36 = vadd.f32 %v705_v9, %v293_v29  ;;  %v294_v38 = vmul.f32 %v547_v31, %v696_v0  ;;  %v311_v40 = vmul.f32 %v582_v35, %v696_v0  ;;  %v295_v44 = vmul.f32 %v550_v39, %v696_v0 }
  0x28   : > { %388 = vxpose.xlu1.b32.cont [5/16] (narrow) %v340_v42, 8  ;;  %v349_v42 = vadd.f32 %v705_v9, %v310_v37  ;;  %v312_v46 = vmul.f32 %v583_v41, %v696_v0 }
  0x29   : > { %356 = vxpose.xlu0.b32.cont [5/16] (narrow) %v324_v43, 8  ;;  %v333_v43 = vadd.f32 %v705_v9, %v294_v38  ;;  %v350_v47 = vadd.f32 %v705_v9, %v311_v40 }
  0x2a   : > { %v351_v50 = vadd.f32 %v705_v9, %v312_v46 }
  0x2c   : > { %389 = vxpose.xlu1.b32.cont [6/16] (narrow) %v341_v48, 8  ;;  %v334_v48 = vadd.f32 %v705_v9, %v295_v44 }
  0x2d   : > { %357 = vxpose.xlu0.b32.cont [6/16] (narrow) %v325_v49, 8  ;;  %v296_v49 = vmul.f32 %v551_v45, %v696_v0 }
  0x2f   : > { %v335_v51 = vadd.f32 %v705_v9, %v296_v49 }
  0x30   : > { %390 = vxpose.xlu1.b32.cont [7/16] (narrow) %v342_v56, 8 }
  0x31   : > { %358 = vxpose.xlu0.b32.cont [7/16] (narrow) %v326_v57, 8 }
  0x34   : > { %391 = vxpose.xlu1.b32.cont [8/16] (narrow) %v343_v60, 8 }
  0x35   : > { %359 = vxpose.xlu0.b32.cont [8/16] (narrow) %v327_v62, 8 }
  0x38   : > { %392 = vxpose.xlu1.b32.cont [9/16] (narrow) %v344_v5, 8 }
  0x39   : > { %360 = vxpose.xlu0.b32.cont [9/16] (narrow) %v328_v7, 8 }
  0x3c   : > { %393 = vxpose.xlu1.b32.cont [10/16] (narrow) %v345_v14, 8 }
  0x3d   : > { %361 = vxpose.xlu0.b32.cont [10/16] (narrow) %v329_v15, 8 }
  0x40   : > { %394 = vxpose.xlu1.b32.cont [11/16] (narrow) %v346_v22, 8 }
  0x41   : > { %362 = vxpose.xlu0.b32.cont [11/16] (narrow) %v330_v23, 8 }
  0x44   : > { %395 = vxpose.xlu1.b32.cont [12/16] (narrow) %v347_v26, 8 }
  0x45   : > { %363 = vxpose.xlu0.b32.cont [12/16] (narrow) %v331_v28, 8 }
  0x48   : > { %396 = vxpose.xlu1.b32.cont [13/16] (narrow) %v348_v34, 8 }
  0x49   : > { %364 = vxpose.xlu0.b32.cont [13/16] (narrow) %v332_v36, 8 }
  0x4c   : > { %397 = vxpose.xlu1.b32.cont [14/16] (narrow) %v349_v42, 8 }
  0x4d   : > { %365 = vxpose.xlu0.b32.cont [14/16] (narrow) %v333_v43, 8 }
  0x50   : > { %398 = vxpose.xlu1.b32.cont [15/16] (narrow) %v350_v47, 8 }
  0x51   : > { %366 = vxpose.xlu0.b32.cont [15/16] (narrow) %v334_v48, 8 }
  0x54   : > { %399 = vxpose.xlu1.b32.end [16/16] (narrow) %v351_v50, 8 }
  0x55   : > { %367 = vxpose.xlu0.b32.end [16/16] (narrow) %v335_v51, 8 }
  0x98   : > { %v400_v52 = vpop.trf.xlu1 }
  0x99   : > { %v368_v53 = vpop.trf.xlu0  ;;  %417 = vst [vmem:[%s208_s27 + $0x8] sm:$0xff] %v400_v52 }
  0x9a   : > { %416 = vst [vmem:[%s208_s27] sm:$0xff] %v368_v53 }
  0x9b PF: > { %s13_s14 = sadd.s32 1, %s645_s14   ;;  %s800_s12 = smov %s641_s13 }
  0x9c   : > { %p10_p5 = scmp.ge.s32.totalorder %s13_s14, 4   ;;  %s801_s13 = smov %s803_s15 }
  0x9e   :  { %12 = sbr.rel (!%p10_p5) target bundleno = 2 (0x2), region = 62 }

// kernel: conv_bn_forward.2
= control target key start
LH: loop header
LB: loop body
LE: loop exit
PB: predicated region body
PF: predicated region fallthrough
CT: control target
= control target key end

     0   :  { %s1361_s15 = smov 0   ;;  %s1363_s16 = smov 0   ;;  %s1523_s0 = inlined_call_operand.vmem [shape: bf16[2,16,16,4], index: 0, kind: input, shape index: {}]   ;;  %s1524_s1 = inlined_call_operand.vmem [shape: bf16[4,128], index: 1, kind: input, shape index: {}]   ;;  %s1525_s2 = inlined_call_operand.vmem [shape: bf16[2,256,128], index: 2, kind: output, shape index: {0}]   ;;  %s1526_s3 = inlined_call_operand.vmem [shape: f32[2,1,8,128], index: 3, kind: output, shape index: {1}]   ;;  %s1527_s4 = inlined_call_operand.vmem [shape: f32[2,1,8,128], index: 4, kind: output, shape index: {2}]  }
   0x1   :  { %s1365_s17 = smov 0  }
   0x2 LB: > { %s27_s18 = sadd.s32 1, %s1330_s16  ;;  %p1015_p0 = scmp.ge.s32.totalorder %s1334_s17, 1  ;;  %s1334_s17 = sphi %s1365_s17, %s15_s17   ;;  %s1330_s16 = sphi %s1363_s16, %s1529_s16   ;;  %s1326_s15 = sphi %s1361_s15, %s1528_s15  }
   0x3   : > { %p29_p1 = scmp.ge.s32.totalorder %s27_s18, 2  ;;  %p185_p2 = scmp.lt.s32.totalorder %s1334_s17, 3 }
   0x5   : > { %s1531_s18 = smov (%p29_p1, %s27_s18), 0  ;;  %p186_p3 = pnand %p1015_p0, %p185_p2 }
   0x6   : > { %v295_v0 = vld [vmem:[%s1524_s1] sm:$0x3] (!%p186_p3)  ;;  %vm425_vm0 = vcmask (!%p186_p3), 1041408   ;;  %p229_p4 = scmp.lt.s32.totalorder (!%p186_p3), %s1326_s15, 1  ;;  %vm376_vm1 = vcmask (!%p186_p3), 31744  }
   0x7   : > { %189 = sbr.rel (%p186_p3) target bundleno = 299 (0x12b), region = 28  ;;  %1270 = vmatprep.subr.msk.bf16.mxu0 (!%p186_p3), %vm425_vm0, %v295_v0  ;;  %v427_v1 = vsel (!%p186_p3), %vm425_vm0, %v295_v0, 0  ;;  %1271 = vmatprep.subr.msk.bf16.mxu1 (!%p186_p3), %vm425_vm0, %v295_v0 }
   0x8   : > { %1235 = vmatpush3.bf16.msra.mxu0 (!%p186_p3), %v427_v1  ;;  %1269 = vmatpush3.bf16.msra.mxu1 (!%p186_p3), %v427_v1 }
   0xe   : > { %s1533_s15 = smov (!%p229_p4, %s1326_s15), 1 }
   0xf   : > { %s1088_s21 = sshll.u32 %s1533_s15, 7  ;;  %s1020_s28 = sshll.u32 %s1533_s15, 3 }
  0x10   : > { %s1390_s24 = scalar_lea.vmem %s1523_s0, %s1088_s21  ;;  %s1429_s27 = scalar_lea.vmem %s1525_s2, %s1088_s21 }
  0x11   : > { %v1296_v2 = vld [vmem:[%s1390_s24] sm:$0xff]   ;;  %v1297_v3 = vld [vmem:[%s1390_s24 + $0x8] sm:$0xff]   ;;  %v1298_v4 = vld [vmem:[%s1390_s24 + $0x10] sm:$0xff]   ;;  %s250_s5 = scalar_lea.vmem %s1526_s3, %s1020_s28  ;;  %s257_s8 = scalar_lea.vmem %s1527_s4, %s1020_s28 }
  0x12   : > { %1236 = vmatprep.mubr.msk.bf16.mxu0 %vm376_vm1, %v1296_v2  ;;  %v1299_v5 = vld [vmem:[%s1390_s24 + $0x18] sm:$0xff]   ;;  %v1300_v6 = vld [vmem:[%s1390_s24 + $0x20] sm:$0xff]   ;;  %v1305_v8 = vld [vmem:[%s1390_s24 + $0x48] sm:$0xff]  }
  0x13   : > { %1237 = vmatmul.mubr.msk.bf16.vlgmr.msra.gmra.mrb[0].mxu0 %vm376_vm1, %v1297_v3  ;;  %v1304_v7 = vld [vmem:[%s1390_s24 + $0x40] sm:$0xff]   ;;  %v1306_v9 = vld [vmem:[%s1390_s24 + $0x50] sm:$0xff]   ;;  %v1301_v10 = vld [vmem:[%s1390_s24 + $0x28] sm:$0xff]  }
  0x14   : > { %1240 = vmatprep.mubr.msk.bf16.mxu0 %vm376_vm1, %v1298_v4  ;;  %1252 = vmatprep.mubr.msk.bf16.mxu1 %vm376_vm1, %v1304_v7  ;;  %v1307_v11 = vld [vmem:[%s1390_s24 + $0x58] sm:$0xff]   ;;  %v1302_v12 = vld [vmem:[%s1390_s24 + $0x30] sm:$0xff]   ;;  %v1308_v13 = vld [vmem:[%s1390_s24 + $0x60] sm:$0xff]  }
  0x15   : > { %1253 = vmatmul.mubr.msk.bf16.vlgmr.msra.gmra.mrb[0].mxu1 %vm376_vm1, %v1305_v8  ;;  %v1303_v14 = vld [vmem:[%s1390_s24 + $0x38] sm:$0xff]   ;;  %v1309_v15 = vld [vmem:[%s1390_s24 + $0x68] sm:$0xff]   ;;  %v1310_v16 = vld [vmem:[%s1390_s24 + $0x70] sm:$0xff]  }
  0x16   : > { %1256 = vmatprep.mubr.msk.bf16.mxu1 %vm376_vm1, %v1306_v9  ;;  %v1311_v17 = vld [vmem:[%s1390_s24 + $0x78] sm:$0xff]  }
  0x1b   : > { %1241 = vmatmul.mubr.msk.bf16.gmra.mrb[4].mxu0 %vm376_vm1, %v1299_v5 }
  0x1c   : > { %1244 = vmatprep.mubr.msk.bf16.mxu0 %vm376_vm1, %v1300_v6 }
  0x1d   : > { %1257 = vmatmul.mubr.msk.bf16.gmra.mrb[4].mxu1 %vm376_vm1, %v1307_v11 }
  0x1e   : > { %1260 = vmatprep.mubr.msk.bf16.mxu1 %vm376_vm1, %v1308_v13 }
  0x23   : > { %1245 = vmatmul.mubr.msk.bf16.gmra.mrb[8].mxu0 %vm376_vm1, %v1301_v10 }
  0x24   : > { %1248 = vmatprep.mubr.msk.bf16.mxu0 %vm376_vm1, %v1302_v12 }
  0x25   : > { %1261 = vmatmul.mubr.msk.bf16.gmra.mrb[8].mxu1 %vm376_vm1, %v1309_v15 }
  0x26   : > { %1264 = vmatprep.mubr.msk.bf16.mxu1 %vm376_vm1, %v1310_v16 }
  0x2b   : > { %1249 = vmatmul.mubr.msk.bf16.gmra.mrb[12].mxu0 %vm376_vm1, %v1303_v14 }
  0x2d   : > { %1265 = vmatmul.mubr.msk.bf16.gmra.mrb[12].mxu1 %vm376_vm1, %v1311_v17 }
  0xe6   : > { %v1238_v18 = vpop.f32.mrb[0].mxu0 }
  0xe7   : > { %v463_v19 = vpop.f32.mrb[1].mxu0  ;;  %v784_v27 = vmul.f32 %v1238_v18, %v1238_v18 }
  0xe8   : > { %v1239_v20 = vpop.f32.mrb[2].mxu0  ;;  %v782_v23 = vmul.f32 %v463_v19, %v463_v19  ;;  %v1433_v34 = vpop.f32.mrb[0].mxu1 }
  0xe9   : > { %v1130_v21 = vpack.c.bf16 %v1239_v20, %v1238_v18  ;;  %v466_v22 = vpop.f32.mrb[3].mxu0  ;;  %v785_v30 = vmul.f32 %v1239_v20, %v1239_v20  ;;  %v1435_v36 = vpop.f32.mrb[1].mxu1 }
  0xea   : > { %v1125_v24 = vpack.c.bf16 %v466_v22, %v463_v19  ;;  %v750_v25 = vadd.f32 %v466_v22, %v463_v19  ;;  %v783_v26 = vmul.f32 %v466_v22, %v466_v22  ;;  %v1437_v41 = vpop.f32.mrb[2].mxu1 }
  0xeb   : > { %1202 = vst [vmem:[%s1429_s27 + $0x8] sm:$0xff] %v1130_v21   ;;  %v1170_v44 = vpack.c.bf16 %v1437_v41, %v1433_v34  ;;  %v1441_v45 = vpop.f32.mrb[3].mxu1 }
  0xec   : > { %1126 = vst [vmem:[%s1429_s27] sm:$0xff] %v1125_v24   ;;  %v751_v28 = vadd.f32 %v1238_v18, %v750_v25  ;;  %v814_v29 = vadd.f32 %v783_v26, %v782_v23  ;;  %v1165_v50 = vpack.c.bf16 %v1441_v45, %v1435_v36 }
  0xed   : > { %1210 = vst [vmem:[%s1429_s27 + $0x48] sm:$0xff] %v1170_v44   ;;  %v798_v44 = vmul.f32 %v1435_v36, %v1435_v36 }
  0xee   : > { %v815_v31 = vadd.f32 %v814_v29, %v784_v27  ;;  %v1242_v32 = vpop.f32.mrb[4].mxu0  ;;  %v752_v33 = vadd.f32 %v1239_v20, %v751_v28  ;;  %1209 = vst [vmem:[%s1429_s27 + $0x40] sm:$0xff] %v1165_v50  }
  0xef   : > { %v479_v35 = vpop.f32.mrb[5].mxu0  ;;  %v788_v51 = vmul.f32 %v1242_v32, %v1242_v32 }
  0xf0   : > { %v753_v37 = vadd.f32 %v752_v33, %v479_v35  ;;  %v786_v38 = vmul.f32 %v479_v35, %v479_v35  ;;  %v816_v39 = vadd.f32 %v815_v31, %v785_v30  ;;  %v1243_v40 = vpop.f32.mrb[6].mxu0  ;;  %v1449_v58 = vpop.f32.mrb[4].mxu1 }
  0xf1   : > { %v1140_v42 = vpack.c.bf16 %v1243_v40, %v1242_v32  ;;  %v482_v43 = vpop.f32.mrb[7].mxu0  ;;  %v789_v54 = vmul.f32 %v1243_v40, %v1243_v40  ;;  %v1451_v60 = vpop.f32.mrb[5].mxu1 }
  0xf2   : > { %v817_v46 = vadd.f32 %v816_v39, %v786_v38  ;;  %v1135_v47 = vpack.c.bf16 %v482_v43, %v479_v35  ;;  %v754_v48 = vadd.f32 %v753_v37, %v482_v43  ;;  %v787_v49 = vmul.f32 %v482_v43, %v482_v43  ;;  %v1453_v1 = vpop.f32.mrb[6].mxu1 }
  0xf3   : > { %1204 = vst [vmem:[%s1429_s27 + $0x18] sm:$0xff] %v1140_v42   ;;  %v1180_v4 = vpack.c.bf16 %v1453_v1, %v1449_v58  ;;  %v1457_v5 = vpop.f32.mrb[7].mxu1 }
  0xf4   : > { %1203 = vst [vmem:[%s1429_s27 + $0x10] sm:$0xff] %v1135_v47   ;;  %v755_v52 = vadd.f32 %v1242_v32, %v754_v48  ;;  %v818_v53 = vadd.f32 %v817_v46, %v787_v49  ;;  %v1175_v10 = vpack.c.bf16 %v1457_v5, %v1451_v60 }
  0xf5   : > { %1212 = vst [vmem:[%s1429_s27 + $0x58] sm:$0xff] %v1180_v4  }
  0xf6   : > { %v819_v55 = vadd.f32 %v818_v53, %v788_v51  ;;  %v1246_v56 = vpop.f32.mrb[8].mxu0  ;;  %v756_v57 = vadd.f32 %v1243_v40, %v755_v52  ;;  %1211 = vst [vmem:[%s1429_s27 + $0x50] sm:$0xff] %v1175_v10  }
  0xf7   : > { %v495_v59 = vpop.f32.mrb[9].mxu0  ;;  %v792_v11 = vmul.f32 %v1246_v56, %v1246_v56 }
  0xf8   : > { %v757_v61 = vadd.f32 %v756_v57, %v495_v59  ;;  %v790_v62 = vmul.f32 %v495_v59, %v495_v59  ;;  %v820_v63 = vadd.f32 %v819_v55, %v789_v54  ;;  %v1247_v0 = vpop.f32.mrb[10].mxu0  ;;  %v1465_v18 = vpop.f32.mrb[8].mxu1  ;;  %v799_v55 = vmul.f32 %v1441_v45, %v1441_v45 }
  0xf9   : > { %v1150_v2 = vpack.c.bf16 %v1247_v0, %v1246_v56  ;;  %v498_v3 = vpop.f32.mrb[11].mxu0  ;;  %v793_v14 = vmul.f32 %v1247_v0, %v1247_v0  ;;  %v559_v20 = vpop.f32.mrb[9].mxu1  ;;  %v800_v57 = vmul.f32 %v1433_v34, %v1433_v34 }
  0xfa   : > { %v821_v6 = vadd.f32 %v820_v63, %v790_v62  ;;  %v1145_v7 = vpack.c.bf16 %v498_v3, %v495_v59  ;;  %v758_v8 = vadd.f32 %v757_v61, %v498_v3  ;;  %v791_v9 = vmul.f32 %v498_v3, %v498_v3  ;;  %v1467_v25 = vpop.f32.mrb[10].mxu1 }
  0xfb   : > { %1206 = vst [vmem:[%s1429_s27 + $0x28] sm:$0xff] %v1150_v2   ;;  %v1190_v28 = vpack.c.bf16 %v1467_v25, %v1465_v18  ;;  %v562_v29 = vpop.f32.mrb[11].mxu1 }
  0xfc   : > { %1205 = vst [vmem:[%s1429_s27 + $0x20] sm:$0xff] %v1145_v7   ;;  %v759_v12 = vadd.f32 %v1246_v56, %v758_v8  ;;  %v822_v13 = vadd.f32 %v821_v6, %v791_v9  ;;  %v1185_v35 = vpack.c.bf16 %v562_v29, %v559_v20  ;;  %v804_v6 = vmul.f32 %v1449_v58, %v1449_v58 }
  0xfd   : > { %1214 = vst [vmem:[%s1429_s27 + $0x68] sm:$0xff] %v1190_v28  }
  0xfe   : > { %v823_v15 = vadd.f32 %v822_v13, %v792_v11  ;;  %v1250_v16 = vpop.f32.mrb[12].mxu0  ;;  %v760_v17 = vadd.f32 %v1247_v0, %v759_v12  ;;  %1213 = vst [vmem:[%s1429_s27 + $0x60] sm:$0xff] %v1185_v35   ;;  %v802_v0 = vmul.f32 %v1451_v60, %v1451_v60 }
  0xff   : > { %v511_v19 = vpop.f32.mrb[13].mxu0  ;;  %v796_v37 = vmul.f32 %v1250_v16, %v1250_v16 }
 0x100   : > { %v761_v21 = vadd.f32 %v760_v17, %v511_v19  ;;  %v794_v22 = vmul.f32 %v511_v19, %v511_v19  ;;  %v824_v23 = vadd.f32 %v823_v15, %v793_v14  ;;  %v1251_v24 = vpop.f32.mrb[14].mxu0  ;;  %v1266_v46 = vpop.f32.mrb[12].mxu1  ;;  %v807_v15 = vmul.f32 %v562_v29, %v562_v29 }
 0x101   : > { %v1160_v26 = vpack.c.bf16 %v1251_v24, %v1250_v16  ;;  %v514_v27 = vpop.f32.mrb[15].mxu0  ;;  %v797_v40 = vmul.f32 %v1251_v24, %v1251_v24  ;;  %v575_v47 = vpop.f32.mrb[13].mxu1  ;;  %v809_v17 = vmul.f32 %v1467_v25, %v1467_v25 }
 0x102   : > { %v825_v30 = vadd.f32 %v824_v23, %v794_v22  ;;  %v1155_v31 = vpack.c.bf16 %v514_v27, %v511_v19  ;;  %v762_v32 = vadd.f32 %v761_v21, %v514_v27  ;;  %v795_v33 = vmul.f32 %v514_v27, %v514_v27  ;;  %v1267_v50 = vpop.f32.mrb[14].mxu1 }
 0x103   : > { %1208 = vst [vmem:[%s1429_s27 + $0x38] sm:$0xff] %v1160_v26   ;;  %v1200_v51 = vpack.c.bf16 %v1267_v50, %v1266_v46  ;;  %v578_v52 = vpop.f32.mrb[15].mxu1  ;;  %v812_v27 = vmul.f32 %v1266_v46, %v1266_v46 }
 0x104   : > { %1207 = vst [vmem:[%s1429_s27 + $0x30] sm:$0xff] %v1155_v31   ;;  %v763_v38 = vadd.f32 %v1250_v16, %v762_v32  ;;  %v826_v39 = vadd.f32 %v825_v30, %v795_v33  ;;  %v1195_v56 = vpack.c.bf16 %v578_v52, %v575_v47  ;;  %v811_v26 = vmul.f32 %v578_v52, %v578_v52 }
 0x105   : > { %1216 = vst [vmem:[%s1429_s27 + $0x78] sm:$0xff] %v1200_v51  }
 0x106   : > { %v827_v42 = vadd.f32 %v826_v39, %v796_v37  ;;  %v764_v43 = vadd.f32 %v1251_v24, %v763_v38  ;;  %1215 = vst [vmem:[%s1429_s27 + $0x70] sm:$0xff] %v1195_v56  }
 0x108   : > { %v765_v48 = vadd.f32 %v764_v43, %v1435_v36  ;;  %v828_v49 = vadd.f32 %v827_v42, %v797_v40  ;;  %v801_v36 = vmul.f32 %v1437_v41, %v1437_v41 }
 0x10a   : > { %v829_v53 = vadd.f32 %v828_v49, %v798_v44  ;;  %v766_v54 = vadd.f32 %v765_v48, %v1441_v45 }
 0x10c   : > { %v767_v59 = vadd.f32 %v1433_v34, %v766_v54  ;;  %v830_v61 = vadd.f32 %v829_v53, %v799_v55  ;;  %v803_v34 = vmul.f32 %v1457_v5, %v1457_v5 }
 0x10e   : > { %v831_v62 = vadd.f32 %v830_v61, %v800_v57  ;;  %v768_v63 = vadd.f32 %v1437_v41, %v767_v59  ;;  %v805_v41 = vmul.f32 %v1453_v1, %v1453_v1 }
 0x110   : > { %v769_v45 = vadd.f32 %v768_v63, %v1451_v60  ;;  %v832_v2 = vadd.f32 %v831_v62, %v801_v36  ;;  %v806_v60 = vmul.f32 %v559_v20, %v559_v20 }
 0x112   : > { %v833_v3 = vadd.f32 %v832_v2, %v802_v0  ;;  %v770_v4 = vadd.f32 %v769_v45, %v1457_v5  ;;  %v808_v5 = vmul.f32 %v1465_v18, %v1465_v18 }
 0x114   : > { %v771_v7 = vadd.f32 %v1449_v58, %v770_v4  ;;  %v834_v8 = vadd.f32 %v833_v3, %v803_v34 }
 0x116   : > { %v835_v9 = vadd.f32 %v834_v8, %v804_v6  ;;  %v772_v10 = vadd.f32 %v1453_v1, %v771_v7  ;;  %v810_v1 = vmul.f32 %v575_v47, %v575_v47 }
 0x118   : > { %v773_v11 = vadd.f32 %v772_v10, %v559_v20  ;;  %v836_v12 = vadd.f32 %v835_v9, %v805_v41 }
 0x11a   : > { %v837_v13 = vadd.f32 %v836_v12, %v806_v60  ;;  %v774_v14 = vadd.f32 %v773_v11, %v562_v29 }
 0x11c   : > { %v775_v16 = vadd.f32 %v1465_v18, %v774_v14  ;;  %v838_v58 = vadd.f32 %v837_v13, %v807_v15  ;;  %v813_v18 = vmul.f32 %v1267_v50, %v1267_v50 }
 0x11e   : > { %v839_v19 = vadd.f32 %v838_v58, %v808_v5  ;;  %v776_v21 = vadd.f32 %v1467_v25, %v775_v16 }
 0x120   : > { %v777_v22 = vadd.f32 %v776_v21, %v575_v47  ;;  %v840_v23 = vadd.f32 %v839_v19, %v809_v17 }
 0x122   : > { %v841_v20 = vadd.f32 %v840_v23, %v810_v1  ;;  %v778_v24 = vadd.f32 %v777_v22, %v578_v52 }
 0x124   : > { %v779_v28 = vadd.f32 %v1266_v46, %v778_v24  ;;  %v842_v29 = vadd.f32 %v841_v20, %v811_v26 }
 0x126   : > { %v780_v30 = vadd.f32 %v1267_v50, %v779_v28  ;;  %v843_v31 = vadd.f32 %v842_v29, %v812_v27 }
 0x128   : > { %781 = vst [vmem:[%s250_s5] sm:$0xff] %v780_v30  ;;  %v844_v25 = vadd.f32 %v843_v31, %v813_v18 }
 0x12a   : > { %845 = vst [vmem:[%s257_s8] sm:$0xff] %v844_v25 }
 0x12b PF: > { %s15_s17 = sadd.s32 1, %s1334_s17   ;;  %s1528_s15 = smov %s1330_s16 }
 0x12c   : > { %p12_p5 = scmp.ge.s32.totalorder %s15_s17, 4   ;;  %s1529_s16 = smov %s1531_s18 }
 0x12e   :  { %14 = sbr.rel (!%p12_p5) target bundleno = 2 (0x2), region = 83 }

</bundles_post_ra>
